<compile_context>
chip_gen: v7x
topology: tpu7x:2x2x1
jax: 0.10.0
libtpu: 0.0.40
codegen_flags: <defaults>
</compile_context>

<pallas_src>
import functools

import jax
import jax.numpy as jnp
from jax.experimental import pallas as pl
from jax.experimental.pallas import tpu as pltpu

_LANE = 128
_VMEM_BUDGET = 40 << 20  # double-buffered tile footprint budget (safe on v7x 64 MiB)


def _round_up(x: int, m: int) -> int:
    return ((x + m - 1) // m) * m


def _ffn_kernel(x_ref, w_ref, b_ref, o_ref):
    # x_ref: (TM, H) bf16, w_ref: (H, TN) bf16, b_ref: (1, TN) f32, o_ref: (TM, TN)
    h = jnp.dot(x_ref[...], w_ref[...], preferred_element_type=jnp.float32)
    h = h + b_ref[...]
    # tanh-approximate GELU -> single EUP transcendental per element, few VALU ops.
    o_ref[...] = jax.nn.gelu(h, approximate=True).astype(o_ref.dtype)


@functools.partial(jax.jit, static_argnames=("tm", "tn"))
def feed_forward(x, w, b, *, tm: int = 1024, tn: int = 1536):
    """x: (B, S, H); w: (H, I); b: (I,). Returns gelu(x @ w + b): (B, S, I)."""
    B, S, H = x.shape
    I = w.shape[1]
    M = B * S

    out_dtype = x.dtype
    compute_dtype = jnp.bfloat16  # fast MXU path on every generation
    cbytes = jnp.dtype(compute_dtype).itemsize
    obytes = jnp.dtype(out_dtype).itemsize
    sub = max(8, 32 // cbytes)  # sublane-packing multiple: 16 for bf16

    # --- tile sizes ---------------------------------------------------------
    TM = min(tm, _round_up(M, sub))
    TN = min(tn, _round_up(I, _LANE))

    def _db_footprint(tm_, tn_):
        # double-buffered: 2 x (x tile + W tile + bias tile + out tile)
        return 2 * (tm_ * H * cbytes + H * tn_ * cbytes + tn_ * 4 + tm_ * tn_ * obytes)

    while _db_footprint(TM, TN) > _VMEM_BUDGET and TN > _LANE:
        TN = max(_LANE, _round_up(TN // 2, _LANE))
    while _db_footprint(TM, TN) > _VMEM_BUDGET and TM > sub:
        TM = max(sub, _round_up(TM // 2, sub))

    Mp = _round_up(M, TM)
    Ip = _round_up(I, TN)
    n_blocks = Ip // TN
    m_blocks = Mp // TM

    # --- operand prep (bf16 MXU operands, f32 bias, zero padding) -----------
    x2d = x.reshape(M, H).astype(compute_dtype)
    if Mp != M:
        x2d = jnp.pad(x2d, ((0, Mp - M), (0, 0)))
    wp = w.astype(compute_dtype)
    if Ip != I:
        wp = jnp.pad(wp, ((0, 0), (0, Ip - I)))
    bp = b.astype(jnp.float32)
    if Ip != I:
        bp = jnp.pad(bp, ((0, Ip - I),))
    b2d = bp.reshape(1, Ip)

    # --- honest scheduler hint ----------------------------------------------
    cost = pl.CostEstimate(
        flops=2 * Mp * H * Ip,
        transcendentals=Mp * Ip,
        bytes_accessed=(
            n_blocks * Mp * H * cbytes   # x re-read once per N block
            + H * Ip * cbytes            # W read once
            + Ip * 4                     # bias
            + Mp * Ip * obytes           # output written once
        ),
    )

    vmem_limit = int(min(48 << 20, max(32 << 20, _db_footprint(TM, TN) + (4 << 20))))

    out = pl.pallas_call(
        _ffn_kernel,
        out_shape=jax.ShapeDtypeStruct((Mp, Ip), out_dtype),
        grid_spec=pltpu.PrefetchScalarGridSpec(
            num_scalar_prefetch=0,
            # N outer, M innermost -> W tile reused across consecutive M steps.
            grid=(n_blocks, m_blocks),
            in_specs=[
                pl.BlockSpec((TM, H), lambda j, i: (i, 0)),
                pl.BlockSpec((H, TN), lambda j, i: (0, j)),
                pl.BlockSpec((1, TN), lambda j, i: (0, j)),
            ],
            out_specs=pl.BlockSpec((TM, TN), lambda j, i: (i, j)),
        ),
        compiler_params=pltpu.CompilerParams(
            # K un-tiled -> both grid axes independent; shard across TCs on v7x.
            dimension_semantics=("parallel", "parallel"),
            vmem_limit_bytes=vmem_limit,
        ),
        cost_estimate=cost,
    )(x2d, wp, b2d)

    return out[:M, :I].reshape(B, S, I)


if __name__ == "__main__":
    # Small config: hidden_size=32, intermediate_size=64, batch=2, seq=8
    B, S, H, I = 2, 8, 32, 64

    key = jax.random.PRNGKey(0)
    kx, kw, kb = jax.random.split(key, 3)

    x = jax.random.normal(kx, (B, S, H), dtype=jnp.float32)
    # deterministic "initializer_range=0.02"-style init for the Linear layer
    w = 0.02 * jax.random.normal(kw, (H, I), dtype=jnp.float32)
    b = 0.02 * jax.random.normal(kb, (I,), dtype=jnp.float32)

    y = feed_forward(x, w, b)
    jax.block_until_ready(y)
    assert y.shape == (B, S, I)

    # Reference computed the same way the kernel computes it
    # (bf16 MXU operands, f32 accumulation, tanh-approximate GELU).
    h_ref = jnp.dot(
        x.astype(jnp.bfloat16), w.astype(jnp.bfloat16),
        preferred_element_type=jnp.float32,
    ) + b.astype(jnp.float32)
    ref = jax.nn.gelu(h_ref, approximate=True).astype(y.dtype)
    assert jnp.allclose(y, ref, atol=1e-4, rtol=1e-4)

    # Loose sanity check against the full-f32 exact-erf formulation
    # (tanh-approx GELU + bf16 operands differ by ~1e-3 relative).
    h_f32 = jnp.dot(x, w, preferred_element_type=jnp.float32) + b
    ref_f32 = 0.5 * h_f32 * (1.0 + jax.lax.erf(h_f32 * (2.0 ** -0.5)))
    assert jnp.allclose(y, ref_f32.astype(y.dtype), atol=5e-3, rtol=5e-3)

    print("KERNEL_OK")
</pallas_src>

<mosaic_0001>
module attributes {stable_mosaic.version = 11 : i64} {
  func.func @_ffn_kernel(%arg0: i32, %arg1: i32, %arg2: memref<16x32xbf16, #tpu.memory_space<vmem>>, %arg3: memref<32x128xbf16, #tpu.memory_space<vmem>>, %arg4: memref<1x128xf32, #tpu.memory_space<vmem>>, %arg5: memref<16x128xf32, #tpu.memory_space<vmem>>) attributes {dimension_semantics = [#tpu.dimension_semantics<parallel>, #tpu.dimension_semantics<parallel>], iteration_bounds = array<i64: 1, 1>, scalar_prefetch = 0 : i64, scratch_operands = 0 : i64, tpu.core_type = #tpu.core_type<tc>, window_params = [{transform_indices = @transform_0, window_bounds = array<i64: 16, 32>}, {transform_indices = @transform_1, window_bounds = array<i64: 32, 128>}, {transform_indices = @transform_2, window_bounds = array<i64: 1, 128>}, {transform_indices = @transform_3, window_bounds = array<i64: 16, 128>}]} {
    %c0 = arith.constant 0 : index
    %c0_0 = arith.constant 0 : index
    %0 = vector.load %arg2[%c0, %c0_0] : memref<16x32xbf16, #tpu.memory_space<vmem>>, vector<16x32xbf16>
    %c0_1 = arith.constant 0 : index
    %c0_2 = arith.constant 0 : index
    %1 = vector.load %arg3[%c0_1, %c0_2] : memref<32x128xbf16, #tpu.memory_space<vmem>>, vector<32x128xbf16>
    %cst = arith.constant dense<0.000000e+00> : vector<16x128xf32>
    %2 = tpu.matmul %0, %1, %cst {dimension_numbers = #tpu.dot_dimension_numbers<[1], [0], [0], [1], [0, 0, 1, 1], [], []>} : vector<16x32xbf16>, vector<32x128xbf16>, vector<16x128xf32> -> vector<16x128xf32>
    %c0_3 = arith.constant 0 : index
    %c0_4 = arith.constant 0 : index
    %3 = vector.load %arg4[%c0_3, %c0_4] : memref<1x128xf32, #tpu.memory_space<vmem>>, vector<1x128xf32>
    %4 = vector.broadcast %3 : vector<1x128xf32> to vector<16x128xf32>
    %5 = arith.addf %2, %4 : vector<16x128xf32>
    %6 = arith.mulf %5, %5 : vector<16x128xf32>
    %7 = arith.mulf %5, %6 : vector<16x128xf32>
    %cst_5 = arith.constant 4.471500e-02 : f32
    %8 = vector.broadcast %cst_5 : f32 to vector<16x128xf32>
    %9 = arith.mulf %8, %7 : vector<16x128xf32>
    %10 = arith.addf %5, %9 : vector<16x128xf32>
    %cst_6 = arith.constant 0.797884583 : f32
    %11 = vector.broadcast %cst_6 : f32 to vector<16x128xf32>
    %12 = arith.mulf %11, %10 : vector<16x128xf32>
    %13 = math.tanh %12 : vector<16x128xf32>
    %cst_7 = arith.constant 1.000000e+00 : f32
    %14 = vector.broadcast %cst_7 : f32 to vector<16x128xf32>
    %15 = arith.addf %14, %13 : vector<16x128xf32>
    %cst_8 = arith.constant 5.000000e-01 : f32
    %16 = vector.broadcast %cst_8 : f32 to vector<16x128xf32>
    %17 = arith.mulf %16, %15 : vector<16x128xf32>
    %18 = arith.mulf %5, %17 : vector<16x128xf32>
    %c0_9 = arith.constant 0 : index
    %c0_10 = arith.constant 0 : index
    %19 = vector.load %arg5[%c0_9, %c0_10] : memref<16x128xf32, #tpu.memory_space<vmem>>, vector<16x128xf32>
    tpu.vector_store %arg5[%c0_9, %c0_10], %18 {strides = array<i32>} : memref<16x128xf32, #tpu.memory_space<vmem>>, vector<16x128xf32>,
    return
  }
  func.func @transform_0(%arg0: i32, %arg1: i32) -> (i32, i32) {
    %c0_i32 = arith.constant 0 : i32
    %c0_i32_0 = arith.constant 0 : i32
    return %arg1, %c0_i32 : i32, i32
  }
  func.func @transform_1(%arg0: i32, %arg1: i32) -> (i32, i32) {
    %c0_i32 = arith.constant 0 : i32
    %c0_i32_0 = arith.constant 0 : i32
    return %c0_i32, %arg0 : i32, i32
  }
  func.func @transform_2(%arg0: i32, %arg1: i32) -> (i32, i32) {
    %c0_i32 = arith.constant 0 : i32
    %c0_i32_0 = arith.constant 0 : i32
    return %c0_i32, %arg0 : i32, i32
  }
  func.func @transform_3(%arg0: i32, %arg1: i32) -> (i32, i32) {
    %c0_i32 = arith.constant 0 : i32
    return %arg1, %arg0 : i32, i32
  }
}

</mosaic_0001>

<bundles_post_ra>
// kernel: feed_forward.1
= control target key start
LH: loop header
LB: loop body
LE: loop exit
PB: predicated region body
PF: predicated region fallthrough
CT: control target
= control target key end

     0   :  { %v139_v0 = vmov 0.0   ;;  %vm140_vm0 = vmmov 0   ;;  %vm45_vm1 = vcmask 261120   ;;  %s179_s1 = inlined_call_operand.vmem [shape: bf16[32,128], index: 1, kind: input, shape index: {}]   ;;  %s180_s0 = inlined_call_operand.vmem [shape: bf16[16,32], index: 0, kind: input, shape index: {}]   ;;  %s181_s2 = inlined_call_operand.vmem [shape: f32[1,128], index: 2, kind: input, shape index: {}]   ;;  %s182_s3 = inlined_call_operand.vmem [shape: f32[16,128], index: 3, kind: output, shape index: {}]  }
   0x1   :  { %122 = vmatprep.subr.bf16.mxu0 %v139_v0  ;;  %v132_v1 = vld [vmem:[%s179_s1] sm:$0xff]   ;;  %126 = vmatprep.mubr.msk.bf16.mxu0 %vm140_vm0, %v139_v0  ;;  %v133_v2 = vld [vmem:[%s179_s1 + $0x8] sm:$0xff]  }
   0x2   :  { %123 = vmatpush3.bf16.msra.mxu0 %v132_v1  ;;  %v134_v3 = vld [vmem:[%s180_s0] sm:$0xff]  }
   0x3   :  { %124 = vmatprep.subr.bf16.mxu0 %v139_v0  ;;  %v114_v4 = vld [vmem:[%s181_s2] ss:$0 sm:$0xff] }
   0x6   :  { %125 = vmatpush3.bf16.msra.mxu0 %v133_v2 }
   0x9   :  { %127 = vmatmul.mubr.msk.bf16.vlgmr.msra.gmra.mrb[0].mxu0 %vm45_vm1, %v134_v3 }
  0xdc   :  { %v83_v5 = vpop.f32.mrb[0].mxu0 }
  0xdd   :  { %v84_v6 = vadd.f32 %v114_v4, %v83_v5  ;;  %v128_v7 = vpop.f32.mrb[1].mxu0 }
  0xde   :  { %v86_v8 = vpop.f32.mrb[2].mxu0 }
  0xdf   :  { %v90_v9 = vmul.f32 %v84_v6, %v84_v6  ;;  %v87_v10 = vadd.f32 %v114_v4, %v86_v8  ;;  %v129_v11 = vpop.f32.mrb[3].mxu0 }
  0xe1   :  { %v92_v12 = vmul.f32 %v90_v9, %v84_v6  ;;  %v91_v13 = vmul.f32 %v87_v10, %v87_v10 }
  0xe3   :  { %v94_v14 = vmul.f32 0.044715, %v92_v12  ;;  %v93_v15 = vmul.f32 %v91_v13, %v87_v10 }
  0xe5   :  { %v96_v16 = vadd.f32 %v94_v14, %v84_v6  ;;  %v95_v17 = vmul.f32 0.044715, %v93_v15 }
  0xe7   :  { %v98_v18 = vmul.f32 0.7978846, %v96_v16  ;;  %v97_v19 = vadd.f32 %v95_v17, %v87_v10 }
  0xe9   :  { %135 = vtanh.f32 %v98_v18  ;;  %v99_v20 = vmul.f32 0.7978846, %v97_v19 }
  0xeb   :  { %137 = vtanh.f32 %v99_v20 }
  0xf3   :  { %v136_v21 = vpop.eup %135 }
  0xf4   :  { %v102_v22 = vadd.f32 1.0, %v136_v21 }
  0xf5   :  { %v138_v23 = vpop.eup %137 }
  0xf6   :  { %v104_v24 = vmul.f32 0.5, %v102_v22  ;;  %v103_v25 = vadd.f32 1.0, %v138_v23 }
  0xf8   :  { %v106_v26 = vmul.f32 %v104_v24, %v84_v6  ;;  %v105_v27 = vmul.f32 0.5, %v103_v25 }
  0xfa   :  { %108 = vst [vmem:[%s182_s3] sm:$0xff] %v106_v26  ;;  %v107_v28 = vmul.f32 %v105_v27, %v87_v10 }
  0xfc   :  { %109 = vst [vmem:[%s182_s3 + $0x8] sm:$0xff] %v107_v28 }

</bundles_post_ra>
